<compile_context>
chip_gen: v6e
topology: v6e:2x2x1
jax: 0.10.0
libtpu: 0.0.40
codegen_flags: <defaults>
</compile_context>

<pallas_src>
import functools

import jax
import jax.numpy as jnp
from jax.experimental import pallas as pl
from jax.experimental.pallas import tpu as pltpu


_HIDDEN = 32
_LANE = 128
_SUBLANE = 8
_TILE_B_MAX = 4096   # big tiles amortize ~0.35us/grid-step; still far under VMEM limits
_SPLIT_MIN = 64      # at/above this batch, use >=2 grid steps (feeds both v7x TCs)


def _round_up(x, m):
    return (x + m - 1) // m * m


def _cdiv(a, b):
    return (a + b - 1) // b


def _policy_kernel(s_ref, w1_ref, b1_ref, w2_ref, b2_ref, wh_ref, bh_ref, out_ref):
    """Fused MLP: fc1 -> relu -> fc2 -> relu -> single fused lane-dense head matmul."""
    x = s_ref[...].astype(jnp.bfloat16)                              # in-kernel cast (free on VPU)
    h1 = jnp.dot(x, w1_ref[...], preferred_element_type=jnp.float32) + b1_ref[...]
    h1 = jnp.maximum(h1, 0.0).astype(jnp.bfloat16)                   # relu in f32, cast for MXU
    h2 = jnp.dot(h1, w2_ref[...], preferred_element_type=jnp.float32) + b2_ref[...]
    h2 = jnp.maximum(h2, 0.0).astype(jnp.bfloat16)
    y = jnp.dot(h2, wh_ref[...], preferred_element_type=jnp.float32) + bh_ref[...]
    out_ref[...] = y.astype(out_ref.dtype)                           # bf16 writeback (lane-dense)


def _choose_tiling(b):
    """Return (tile_b, b_padded) for a batch of b rows."""
    if b < _SPLIT_MIN:
        # Single tile equal to the full array: legal even if not a multiple of 8,
        # and avoids any wrapper-side pad/copy of the state.
        return b, b
    if b <= 2 * _TILE_B_MAX:
        # At least two grid steps so a v7x megacore can split the "parallel" axis.
        tile_b = _round_up(_cdiv(b, 2), _SUBLANE)
        return tile_b, 2 * tile_b
    # Large batch: fixed big tiles; last (ragged) tile is masked by Pallas.
    return _TILE_B_MAX, _round_up(b, _SUBLANE)


@functools.partial(jax.jit, static_argnames=("max_stocks", "max_x", "max_y"))
def _forward_impl(state, w1, b1, w2, b2, wh, bh, *, max_stocks, max_x, max_y):
    b, state_size = state.shape
    head_pad = wh.shape[1]
    n_heads = max_stocks + max_x + max_y

    tile_b, b_padded = _choose_tiling(b)
    if b_padded != b:
        state = jnp.pad(state, ((0, b_padded - b), (0, 0)))
    grid = (_cdiv(b_padded, tile_b),)

    def resident(shape):
        return pl.BlockSpec(shape, lambda i: (0, 0))

    flops = 2 * b_padded * (state_size * _HIDDEN + _HIDDEN * _HIDDEN + _HIDDEN * head_pad)
    bytes_accessed = (
        state.size * 4
        + (w1.size + w2.size + wh.size) * 2
        + (b1.size + b2.size + bh.size) * 4
        + b_padded * head_pad * 2
    )

    out = pl.pallas_call(
        _policy_kernel,
        out_shape=jax.ShapeDtypeStruct((b_padded, head_pad), jnp.bfloat16),
        grid=grid,
        in_specs=[
            pl.BlockSpec((tile_b, state_size), lambda i: (i, 0)),  # activations: row-tiled
            resident(w1.shape),
            resident(b1.shape),
            resident(w2.shape),
            resident(b2.shape),
            resident(wh.shape),
            resident(bh.shape),
        ],
        out_specs=pl.BlockSpec((tile_b, head_pad), lambda i: (i, 0)),
        compiler_params=pltpu.CompilerParams(dimension_semantics=("parallel",)),
        cost_estimate=pl.CostEstimate(
            flops=flops, transcendentals=0, bytes_accessed=bytes_accessed),
    )(state, w1, b1, w2, b2, wh, bh)

    stock_logits = out[:b, :max_stocks].astype(jnp.float32)
    x_logits = out[:b, max_stocks:max_stocks + max_x].astype(jnp.float32)
    y_logits = out[:b, max_stocks + max_x:n_heads].astype(jnp.float32)
    return stock_logits, x_logits, y_logits


def pack_params(params):
    """One-time packing: fuse + lane-pad the three heads, cast weights to bf16.

    Do this ONCE and reuse the result across calls (keeps per-call XLA work ~zero)."""
    max_stocks = params["ws"].shape[1]
    max_x = params["wx"].shape[1]
    max_y = params["wy"].shape[1]
    n_heads = max_stocks + max_x + max_y
    head_pad = _round_up(n_heads, _LANE)

    wh = jnp.concatenate([params["ws"], params["wx"], params["wy"]], axis=1)
    bh = jnp.concatenate([params["bs"], params["bx"], params["by"]], axis=1).reshape(1, n_heads)
    return {
        "w1": params["w1"].astype(jnp.bfloat16),
        "b1": params["b1"].astype(jnp.float32).reshape(1, _HIDDEN),
        "w2": params["w2"].astype(jnp.bfloat16),
        "b2": params["b2"].astype(jnp.float32).reshape(1, _HIDDEN),
        "wh": jnp.pad(wh, ((0, 0), (0, head_pad - n_heads))).astype(jnp.bfloat16),
        "bh": jnp.pad(bh, ((0, 0), (0, head_pad - n_heads))).astype(jnp.float32),
        "head_sizes": (max_stocks, max_x, max_y),   # static python ints
    }


def policy_network_forward(state, packed_params):
    """state: (B, state_size) f32; packed_params: output of pack_params().

    Returns (stock_logits, x_logits, y_logits) in float32."""
    ms, mx, my = packed_params["head_sizes"]
    return _forward_impl(
        state,
        packed_params["w1"], packed_params["b1"],
        packed_params["w2"], packed_params["b2"],
        packed_params["wh"], packed_params["bh"],
        max_stocks=ms, max_x=mx, max_y=my)


def init_params(key, state_size, max_stocks, max_x, max_y):
    """Deterministic init mimicking PyTorch nn.Linear (uniform +-1/sqrt(fan_in)).

    Weights stored as (in_features, out_features) for x @ W; biases as (1, out)."""
    def linear(k, fan_in, fan_out):
        kw, kb = jax.random.split(k)
        bound = 1.0 / jnp.sqrt(jnp.float32(fan_in))
        w = jax.random.uniform(kw, (fan_in, fan_out), jnp.float32, -bound, bound)
        bias = jax.random.uniform(kb, (1, fan_out), jnp.float32, -bound, bound)
        return w, bias

    k1, k2, k3, k4, k5 = jax.random.split(key, 5)
    w1, b1 = linear(k1, state_size, _HIDDEN)
    w2, b2 = linear(k2, _HIDDEN, _HIDDEN)
    ws, bs = linear(k3, _HIDDEN, max_stocks)
    wx, bx = linear(k4, _HIDDEN, max_x)
    wy, by = linear(k5, _HIDDEN, max_y)
    return {
        "w1": w1, "b1": b1,
        "w2": w2, "b2": b2,
        "ws": ws, "bs": bs,
        "wx": wx, "bx": bx,
        "wy": wy, "by": by,
    }


def _reference_forward(state, params):
    """Plain-JAX reference emulating the kernel's bf16-weight / f32-accumulate /
    bf16-output math."""
    x = state.astype(jnp.bfloat16)
    w1 = params["w1"].astype(jnp.bfloat16)
    w2 = params["w2"].astype(jnp.bfloat16)
    h1 = jnp.dot(x, w1, preferred_element_type=jnp.float32) + params["b1"]
    h1 = jnp.maximum(h1, 0.0).astype(jnp.bfloat16)
    h2 = jnp.dot(h1, w2, preferred_element_type=jnp.float32) + params["b2"]
    h2 = jnp.maximum(h2, 0.0).astype(jnp.bfloat16)

    def head(w, bias):
        y = jnp.dot(h2, w.astype(jnp.bfloat16),
                    preferred_element_type=jnp.float32) + bias
        return y.astype(jnp.bfloat16).astype(jnp.float32)

    return (
        head(params["ws"], params["bs"]),
        head(params["wx"], params["bx"]),
        head(params["wy"], params["by"]),
    )


if __name__ == "__main__":
    # Small shapes consistent with the module's forward.
    batch = 2
    state_size = 16
    max_stocks = 8
    max_x = 16
    max_y = 16

    key = jax.random.PRNGKey(0)
    k_state, k_params = jax.random.split(key)

    state = jax.random.normal(k_state, (batch, state_size), dtype=jnp.float32)
    params = init_params(k_params, state_size, max_stocks, max_x, max_y)

    packed = pack_params(params)  # one-time packing, reused across calls
    jax.block_until_ready(packed)

    stock_logits, x_logits, y_logits = policy_network_forward(state, packed)
    jax.block_until_ready((stock_logits, x_logits, y_logits))

    # Verify against the bf16-emulating plain-JAX reference.
    ref = _reference_forward(state, params)
    for got, want in zip((stock_logits, x_logits, y_logits), ref):
        assert got.shape == want.shape, (got.shape, want.shape)
        assert jnp.allclose(got, want, atol=1e-2, rtol=1e-2), (
            float(jnp.max(jnp.abs(got - want))))

    print("KERNEL_OK")
</pallas_src>

<mosaic_0001>
module attributes {stable_mosaic.version = 11 : i64} {
  func.func @_policy_kernel(%arg0: i32, %arg1: memref<2x16xf32, #tpu.memory_space<vmem>>, %arg2: memref<16x32xbf16, #tpu.memory_space<vmem>>, %arg3: memref<1x32xf32, #tpu.memory_space<vmem>>, %arg4: memref<32x32xbf16, #tpu.memory_space<vmem>>, %arg5: memref<1x32xf32, #tpu.memory_space<vmem>>, %arg6: memref<32x128xbf16, #tpu.memory_space<vmem>>, %arg7: memref<1x128xf32, #tpu.memory_space<vmem>>, %arg8: memref<2x128xbf16, #tpu.memory_space<vmem>>) attributes {dimension_semantics = [#tpu.dimension_semantics<parallel>], iteration_bounds = array<i64: 1>, scalar_prefetch = 0 : i64, scratch_operands = 0 : i64, tpu.core_type = #tpu.core_type<tc>, window_params = [{transform_indices = @transform_0, window_bounds = array<i64: 2, 16>}, {pipeline_mode = #tpu.pipeline_mode<synchronous>, transform_indices = @transform_1, window_bounds = array<i64: 16, 32>}, {pipeline_mode = #tpu.pipeline_mode<synchronous>, transform_indices = @transform_2, window_bounds = array<i64: 1, 32>}, {pipeline_mode = #tpu.pipeline_mode<synchronous>, transform_indices = @transform_3, window_bounds = array<i64: 32, 32>}, {pipeline_mode = #tpu.pipeline_mode<synchronous>, transform_indices = @transform_4, window_bounds = array<i64: 1, 32>}, {pipeline_mode = #tpu.pipeline_mode<synchronous>, transform_indices = @transform_5, window_bounds = array<i64: 32, 128>}, {pipeline_mode = #tpu.pipeline_mode<synchronous>, transform_indices = @transform_6, window_bounds = array<i64: 1, 128>}, {transform_indices = @transform_7, window_bounds = array<i64: 2, 128>}]} {
    %c0 = arith.constant 0 : index
    %c0_0 = arith.constant 0 : index
    %0 = vector.load %arg1[%c0, %c0_0] : memref<2x16xf32, #tpu.memory_space<vmem>>, vector<2x16xf32>
    %1 = arith.truncf %0 : vector<2x16xf32> to vector<2x16xbf16>
    %c0_1 = arith.constant 0 : index
    %c0_2 = arith.constant 0 : index
    %2 = vector.load %arg2[%c0_1, %c0_2] : memref<16x32xbf16, #tpu.memory_space<vmem>>, vector<16x32xbf16>
    %cst = arith.constant dense<0.000000e+00> : vector<2x32xf32>
    %3 = tpu.matmul %1, %2, %cst {dimension_numbers = #tpu.dot_dimension_numbers<[1], [0], [0], [1], [0, 0, 1, 1], [], []>} : vector<2x16xbf16>, vector<16x32xbf16>, vector<2x32xf32> -> vector<2x32xf32>
    %c0_3 = arith.constant 0 : index
    %c0_4 = arith.constant 0 : index
    %4 = vector.load %arg3[%c0_3, %c0_4] : memref<1x32xf32, #tpu.memory_space<vmem>>, vector<1x32xf32>
    %5 = vector.broadcast %4 : vector<1x32xf32> to vector<2x32xf32>
    %6 = arith.addf %3, %5 : vector<2x32xf32>
    %cst_5 = arith.constant 0.000000e+00 : f32
    %7 = vector.broadcast %cst_5 : f32 to vector<2x32xf32>
    %8 = arith.maximumf %6, %7 : vector<2x32xf32>
    %9 = arith.truncf %8 : vector<2x32xf32> to vector<2x32xbf16>
    %c0_6 = arith.constant 0 : index
    %c0_7 = arith.constant 0 : index
    %10 = vector.load %arg4[%c0_6, %c0_7] : memref<32x32xbf16, #tpu.memory_space<vmem>>, vector<32x32xbf16>
    %cst_8 = arith.constant dense<0.000000e+00> : vector<2x32xf32>
    %11 = tpu.matmul %9, %10, %cst_8 {dimension_numbers = #tpu.dot_dimension_numbers<[1], [0], [0], [1], [0, 0, 1, 1], [], []>} : vector<2x32xbf16>, vector<32x32xbf16>, vector<2x32xf32> -> vector<2x32xf32>
    %c0_9 = arith.constant 0 : index
    %c0_10 = arith.constant 0 : index
    %12 = vector.load %arg5[%c0_9, %c0_10] : memref<1x32xf32, #tpu.memory_space<vmem>>, vector<1x32xf32>
    %13 = vector.broadcast %12 : vector<1x32xf32> to vector<2x32xf32>
    %14 = arith.addf %11, %13 : vector<2x32xf32>
    %cst_11 = arith.constant 0.000000e+00 : f32
    %15 = vector.broadcast %cst_11 : f32 to vector<2x32xf32>
    %16 = arith.maximumf %14, %15 : vector<2x32xf32>
    %17 = arith.truncf %16 : vector<2x32xf32> to vector<2x32xbf16>
    %c0_12 = arith.constant 0 : index
    %c0_13 = arith.constant 0 : index
    %18 = vector.load %arg6[%c0_12, %c0_13] : memref<32x128xbf16, #tpu.memory_space<vmem>>, vector<32x128xbf16>
    %cst_14 = arith.constant dense<0.000000e+00> : vector<2x128xf32>
    %19 = tpu.matmul %17, %18, %cst_14 {dimension_numbers = #tpu.dot_dimension_numbers<[1], [0], [0], [1], [0, 0, 1, 1], [], []>} : vector<2x32xbf16>, vector<32x128xbf16>, vector<2x128xf32> -> vector<2x128xf32>
    %c0_15 = arith.constant 0 : index
    %c0_16 = arith.constant 0 : index
    %20 = vector.load %arg7[%c0_15, %c0_16] : memref<1x128xf32, #tpu.memory_space<vmem>>, vector<1x128xf32>
    %21 = vector.broadcast %20 : vector<1x128xf32> to vector<2x128xf32>
    %22 = arith.addf %19, %21 : vector<2x128xf32>
    %23 = arith.truncf %22 : vector<2x128xf32> to vector<2x128xbf16>
    %c0_17 = arith.constant 0 : index
    %c0_18 = arith.constant 0 : index
    %24 = vector.load %arg8[%c0_17, %c0_18] : memref<2x128xbf16, #tpu.memory_space<vmem>>, vector<2x128xbf16>
    tpu.vector_store %arg8[%c0_17, %c0_18], %23 {strides = array<i32>} : memref<2x128xbf16, #tpu.memory_space<vmem>>, vector<2x128xbf16>,
    return
  }
  func.func @transform_0(%arg0: i32) -> (i32, i32) {
    %c0_i32 = arith.constant 0 : i32
    %c0_i32_0 = arith.constant 0 : i32
    return %arg0, %c0_i32 : i32, i32
  }
  func.func @transform_1(%arg0: i32) -> (i32, i32) {
    %c0_i32 = arith.constant 0 : i32
    %c0_i32_0 = arith.constant 0 : i32
    %c0_i32_1 = arith.constant 0 : i32
    return %c0_i32, %c0_i32_0 : i32, i32
  }
  func.func @transform_2(%arg0: i32) -> (i32, i32) {
    %c0_i32 = arith.constant 0 : i32
    %c0_i32_0 = arith.constant 0 : i32
    %c0_i32_1 = arith.constant 0 : i32
    return %c0_i32, %c0_i32_0 : i32, i32
  }
  func.func @transform_3(%arg0: i32) -> (i32, i32) {
    %c0_i32 = arith.constant 0 : i32
    %c0_i32_0 = arith.constant 0 : i32
    %c0_i32_1 = arith.constant 0 : i32
    return %c0_i32, %c0_i32_0 : i32, i32
  }
  func.func @transform_4(%arg0: i32) -> (i32, i32) {
    %c0_i32 = arith.constant 0 : i32
    %c0_i32_0 = arith.constant 0 : i32
    %c0_i32_1 = arith.constant 0 : i32
    return %c0_i32, %c0_i32_0 : i32, i32
  }
  func.func @transform_5(%arg0: i32) -> (i32, i32) {
    %c0_i32 = arith.constant 0 : i32
    %c0_i32_0 = arith.constant 0 : i32
    %c0_i32_1 = arith.constant 0 : i32
    return %c0_i32, %c0_i32_0 : i32, i32
  }
  func.func @transform_6(%arg0: i32) -> (i32, i32) {
    %c0_i32 = arith.constant 0 : i32
    %c0_i32_0 = arith.constant 0 : i32
    %c0_i32_1 = arith.constant 0 : i32
    return %c0_i32, %c0_i32_0 : i32, i32
  }
  func.func @transform_7(%arg0: i32) -> (i32, i32) {
    %c0_i32 = arith.constant 0 : i32
    %c0_i32_0 = arith.constant 0 : i32
    return %arg0, %c0_i32 : i32, i32
  }
}

</mosaic_0001>

<bundles_post_ra>
// kernel: _forward_impl.1
= control target key start
LH: loop header
LB: loop body
LE: loop exit
PB: predicated region body
PF: predicated region fallthrough
CT: control target
= control target key end

     0   :  { %12 = vsyncpa [#allocation3], 0  ;;  %s462_s0 = inlined_call_operand.vmem [shape: f32[2,16], index: 0, kind: input, shape index: {}]   ;;  %s463_s1 = inlined_call_operand.hbm [shape: bf16[16,32], index: 1, kind: input, shape index: {}]   ;;  %s464_s2 = inlined_call_operand.vmem [shape: f32[1,32], index: 2, kind: input, shape index: {}]   ;;  %s465_s3 = inlined_call_operand.hbm [shape: bf16[32,32], index: 3, kind: input, shape index: {}]   ;;  %s466_s4 = inlined_call_operand.vmem [shape: f32[1,32], index: 4, kind: input, shape index: {}]   ;;  %s467_s5 = inlined_call_operand.hbm [shape: bf16[32,128], index: 5, kind: input, shape index: {}]   ;;  %s468_s6 = inlined_call_operand.vmem [shape: f32[1,128], index: 6, kind: input, shape index: {}]   ;;  %s469_s7 = inlined_call_operand.vmem [shape: bf16[2,128], index: 7, kind: output, shape index: {}]  }
   0x1   :  { %13 = vsyncpa [#allocation5], 0  ;;  %s391_s24 = smov [#allocation4]   ;;  %s392_s26 = smov [#allocation2]  }
   0x2   :  { %s35_s25 = sshll.u32 %s391_s24, 4  ;;  %s21_s27 = sshll.u32 %s392_s26, 4  ;;  %s36_s25 = int_to_ptr.vmem [resolvable:$true] %s35_s25  ;;  %s22_s27 = int_to_ptr.vmem [resolvable:$true] %s21_s27 }
   0x3   :  { %s335_s28 = scalar_lea.vmem %s36_s25, 256  ;;  %p340_p1 = scmp.lt.s32.totalorder %s36_s25, %s36_s25 }
   0x4   :  { %p336_p0 = scmp.ne.s32.totalorder %s36_s25, %s335_s28  ;;  %p341_p2 = scmp.lt.s32.totalorder %s335_s28, %s335_s28 }
   0x6   :  { %p342_p3 = por %p341_p2, %p340_p1 }
   0x8   :  { %p343_p4 = pnand %p342_p3, %p336_p0 }
   0xa   :  { %346 = shalt.err (!%p343_p4)
}
   0xb   :  { %s393_s29 = smov 64   ;;  %s394_s30 = smov 4  }
   0xc   :  { %41 = dma.hbm_to_vmem [thread:$0]  %s465_s3, 256, %s36_s25, [#allocation5], %s393_s29, %s393_s29, %s394_s30  }
   0xd   :  { %s355_s10 = scalar_lea.vmem %s22_s27, 128  ;;  %p360_p6 = scmp.lt.s32.totalorder %s22_s27, %s22_s27 }
   0xe   :  { %p356_p5 = scmp.ne.s32.totalorder %s22_s27, %s355_s10  ;;  %p361_p7 = scmp.lt.s32.totalorder %s355_s10, %s355_s10 }
  0x10   :  { %p362_p8 = por %p361_p7, %p360_p6 }
  0x12   :  { %p363_p9 = pnand %p362_p8, %p356_p5 }
  0x14   :  { %366 = shalt.err (!%p363_p9)
}
  0x15   :  { %27 = dma.hbm_to_vmem [thread:$0]  %s463_s1, 128, %s22_s27, [#allocation3], %s393_s29, %s393_s29, %s394_s30  }
  0x16   :  { %s395_s13 = smov [#allocation6]  }
  0x17   :  { %s49_s14 = sshll.u32 %s395_s13, 4  ;;  %s50_s14 = int_to_ptr.vmem [resolvable:$true] %s49_s14 }
  0x18   :  { %s375_s15 = scalar_lea.vmem %s50_s14, 256  ;;  %p380_p11 = scmp.lt.s32.totalorder %s50_s14, %s50_s14 }
  0x19   :  { %p376_p10 = scmp.ne.s32.totalorder %s50_s14, %s375_s15  ;;  %p381_p12 = scmp.lt.s32.totalorder %s375_s15, %s375_s15 }
  0x1b   :  { %p382_p13 = por %p381_p12, %p380_p11 }
  0x1d   :  { %p383_p0 = pnand %p382_p13, %p376_p10 }
  0x1f   :  { %386 = shalt.err (!%p383_p0)
}
  0x20   :  { %55 = dma.hbm_to_vmem [thread:$0]  %s467_s5, 256, %s50_s14, [#allocation5], %s393_s29, %s393_s29, %s394_s30  }
  0x21   :  { %387 = dma.done.wait [#allocation3], 128  }
  0x22   :  { %388 = vsyncadd [#allocation3], 4294967168 }
  0x23   :  { %389 = dma.done.wait [#allocation5], 512  }
  0x24   :  { %390 = vsyncadd [#allocation5], 4294966784  ;;  %v396_v0 = vmov 0.0   ;;  %vm397_vm0 = vmmov 0   ;;  %v322_v1 = vld [vmem:[#allocation2] sm:$0xff]   ;;  %vm85_vm1 = vcmask 130048  }
  0x25   :  { %293 = vmatprep.subr.bf16.mxu0 %v396_v0  ;;  %295 = vmatprep.mubr.msk.bf16.mxu0 %vm397_vm0, %v396_v0  ;;  %v68_v2 = vld [vmem:[%s462_s0] sm:$0x3]  ;;  %v323_v4 = vld [vmem:[#allocation4 + $0x8] sm:$0xff]   ;;  %v324_v5 = vld [vmem:[#allocation4] sm:$0xff]   ;;  %vm154_vm2 = vcmask 261120  }
  0x26   :  { %299 = vmatprep.subr.bf16.mxu1 %v396_v0  ;;  %303 = vmatprep.mubr.msk.bf16.mxu1 %vm397_vm0, %v396_v0  ;;  %v69_v3 = vpack.c.bf16 %v68_v2, %v68_v2  ;;  %v325_v6 = vld [vmem:[#allocation6 + $0x8] sm:$0xff]   ;;  %v326_v15 = vld [vmem:[#allocation6] sm:$0xff]  }
  0x27   :  { %294 = vmatpush3.bf16.msra.mxu0 %v322_v1  ;;  %300 = vmatpush3.bf16.msra.mxu1 %v323_v4  ;;  %v274_v7 = vld [vmem:[%s464_s2] ss:$0 sm:$0xff] }
  0x28   :  { %307 = vmatprep.subr.bf16.mxu0 %v396_v0  ;;  %301 = vmatprep.subr.bf16.mxu1 %v396_v0  ;;  %v277_v16 = vld [vmem:[%s466_s4] ss:$0 sm:$0xff] }
  0x29   :  { %v281_v24 = vld [vmem:[%s468_s6] ss:$0 sm:$0xff] }
  0x2a   :  { %296 = vmatmul.mubr.msk.bf16.vlgmr.msra.gmra.mxu0 %vm85_vm1, %v69_v3 }
  0x2b   :  { %311 = vmatprep.mubr.msk.bf16.mxu0 %vm397_vm0, %v396_v0  ;;  %302 = vmatpush3.bf16.msra.mxu1 %v324_v5 }
  0x2c   :  { %308 = vmatpush3.bf16.msra.mxu0 %v325_v6 }
  0x2d   :  { %309 = vmatprep.subr.bf16.mxu0 %v396_v0 }
  0x30   :  { %310 = vmatpush3.bf16.msra.mxu0 %v326_v15 }
  0xea   :  { %v123_v8 = vpop.f32.mrf.mxu0 }
  0xeb   :  { %v124_v9 = vadd.f32 %v274_v7, %v123_v8 }
  0xec   :  { %v297_v10 = vpop.f32.mrf.mxu0 }
  0xed   :  { %v129_v11 = vmax.f32 %v124_v9, 0.0 }
  0xee   :  { %v126_v12 = vpop.f32.mrf.mxu0 }
  0xef   :  { %v130_v13 = vpack.c.bf16 %v129_v11, %v129_v11 }
  0xf0   :  { %v298_v14 = vpop.f32.mrf.mxu0 }
  0xf1   :  { %304 = vmatmul.mubr.msk.bf16.vlgmr.msra.gmra.mxu1 %vm154_vm2, %v130_v13 }
 0x1b1   :  { %v192_v17 = vpop.f32.mrf.mxu1 }
 0x1b2   :  { %v193_v18 = vadd.f32 %v277_v16, %v192_v17 }
 0x1b3   :  { %v305_v19 = vpop.f32.mrf.mxu1 }
 0x1b4   :  { %v198_v20 = vmax.f32 %v193_v18, 0.0 }
 0x1b5   :  { %v195_v21 = vpop.f32.mrf.mxu1 }
 0x1b6   :  { %v199_v22 = vpack.c.bf16 %v198_v20, %v198_v20 }
 0x1b7   :  { %v306_v23 = vpop.f32.mrf.mxu1 }
 0x1b8   :  { %312 = vmatmul.mubr.msk.bf16.vlgmr.msra.gmra.mxu0 %vm154_vm2, %v199_v22 }
 0x278   :  { %v260_v25 = vpop.f32.mrf.mxu0 }
 0x279   :  { %v261_v26 = vadd.f32 %v281_v24, %v260_v25 }
 0x27a   :  { %v313_v27 = vpop.f32.mrf.mxu0 }
 0x27b   :  { %v266_v28 = vpack.c.bf16 %v261_v26, %v261_v26 }
 0x27c   :  { %v263_v29 = vpop.f32.mrf.mxu0 }
 0x27d   :  { %267 = vst [vmem:[%s469_s7] sm:$0x1] %v266_v28 }
 0x27e   :  { %v314_v30 = vpop.f32.mrf.mxu0 }
 0x27f   :  { %272 = vsyncpa [#allocation3], 1 }
 0x280   :  { %273 = vsyncpa [#allocation5], 1 }

</bundles_post_ra>
